<compile_context>
chip_gen: v5e
topology: v5e:2x2
jax: 0.10.0
libtpu: 0.0.40
codegen_flags: <defaults>
</compile_context>

<pallas_src>
import jax
import jax.numpy as jnp
from jax.experimental import pallas as pl
from jax.experimental.pallas import tpu as pltpu


def _round_up(x, m):
    return ((x + m - 1) // m) * m


def two_mlp_head_kernel(x_ref, w6_ref, b6_ref, w7_ref, b7_ref, o_ref, acc_ref):
    """One (M-tile, K-tile) grid step of: relu(relu(X @ W6 + b6) @ W7 + b7)."""
    k = pl.program_id(1)

    @pl.when(k == 0)
    def _():
        acc_ref[...] = jnp.zeros_like(acc_ref)

    # fc6 partial product on the MXU: bf16 inputs, f32 accumulation.
    acc_ref[...] += jnp.dot(x_ref[...], w6_ref[...],
                            preferred_element_type=jnp.float32)

    @pl.when(k == pl.num_programs(1) - 1)
    def _():
        # Bias + ReLU in f32, then fc7 (bf16 MXU inputs, f32 acc) + ReLU.
        h = jnp.maximum(acc_ref[...] + b6_ref[...], 0.0)
        h2 = jnp.dot(h.astype(w7_ref.dtype), w7_ref[...],
                     preferred_element_type=jnp.float32)
        o_ref[...] = jnp.maximum(h2 + b7_ref[...], 0.0).astype(o_ref.dtype)


def two_mlp_head(x_nchw, w6, b6, w7, b7, *, tile_m=128, tile_k=512):
    """x_nchw: (N, C, H, W); w6: (C*H*W, R); b6: (R,); w7: (R, R); b7: (R,).

    Weights are stored (in_features, out_features), so X @ W + b equals
    PyTorch's x @ W.T + b with W of shape (out, in).
    """
    n = x_nchw.shape[0]
    in_features, rep = w6.shape
    assert w7.shape == (rep, rep)
    assert b6.shape == (rep,) and b7.shape == (rep,)
    # Keep the output lane-dense (no masked vst.msk partial stores).
    assert rep % 128 == 0, "representation_size must be a multiple of 128"

    # Flatten exactly like torch's x.flatten(start_dim=1) (row-major).
    x2d = x_nchw.reshape(n, -1)
    assert x2d.shape[1] == in_features

    # bf16 MXU inputs; accumulation + bias/ReLU happen in f32 inside the kernel.
    x_bf = x2d.astype(jnp.bfloat16)
    w6_bf = w6.astype(jnp.bfloat16)
    w7_bf = w7.astype(jnp.bfloat16)
    b6_2d = b6.reshape(1, rep).astype(jnp.float32)
    b7_2d = b7.reshape(1, rep).astype(jnp.float32)

    # MXU-friendly tile sizes (multiples of 128), clamped to the problem size.
    tile_m = max(16, min(tile_m, _round_up(n, 128)))
    tile_k = min(tile_k, _round_up(in_features, 128))

    # Zero-pad the reduction dim so partial K-slabs contribute exact zeros.
    k_pad = _round_up(in_features, tile_k)
    if k_pad != in_features:
        x_bf = jnp.pad(x_bf, ((0, 0), (0, k_pad - in_features)))
        w6_bf = jnp.pad(w6_bf, ((0, k_pad - in_features), (0, 0)))

    grid = (pl.cdiv(n, tile_m), k_pad // tile_k)

    cost = pl.CostEstimate(
        flops=2 * n * in_features * rep + 2 * n * rep * rep,
        transcendentals=0,
        bytes_accessed=(x_bf.size * 2 + w6_bf.size * 2 + w7_bf.size * 2
                        + b6_2d.size * 4 + b7_2d.size * 4 + n * rep * 4),
    )

    return pl.pallas_call(
        two_mlp_head_kernel,
        out_shape=jax.ShapeDtypeStruct((n, rep), jnp.float32),
        grid_spec=pltpu.PrefetchScalarGridSpec(
            num_scalar_prefetch=0,
            grid=grid,
            in_specs=[
                pl.BlockSpec((tile_m, tile_k), lambda i, k: (i, k)),  # X M/K tile
                pl.BlockSpec((tile_k, rep), lambda i, k: (k, 0)),     # W6 K slab
                pl.BlockSpec((1, rep), lambda i, k: (0, 0)),          # b6
                pl.BlockSpec((rep, rep), lambda i, k: (0, 0)),        # W7 (resident)
                pl.BlockSpec((1, rep), lambda i, k: (0, 0)),          # b7
            ],
            out_specs=pl.BlockSpec((tile_m, rep), lambda i, k: (i, 0)),
            scratch_shapes=[pltpu.VMEM((tile_m, rep), jnp.float32)],
        ),
        compiler_params=pltpu.CompilerParams(
            dimension_semantics=("parallel", "arbitrary"),
            vmem_limit_bytes=64 * 1024 * 1024,
        ),
        cost_estimate=cost,
    )(x_bf, w6_bf, b6_2d, w7_bf, b7_2d)


if __name__ == "__main__":
    # Small shapes consistent with the module's forward:
    #   x: (N=128, C=4, H=8, W=8) -> in_channels = 4*8*8 = 256
    #   representation_size = 128
    N, C, H, W = 128, 4, 8, 8
    in_channels = C * H * W
    representation_size = 128

    key = jax.random.PRNGKey(0)
    kx, k6w, k6b, k7w, k7b = jax.random.split(key, 5)

    x = jax.random.normal(kx, (N, C, H, W), dtype=jnp.float32)
    # Deterministic synthetic parameters (roughly Kaiming-scaled).
    w6 = jax.random.normal(k6w, (in_channels, representation_size),
                           dtype=jnp.float32) * (1.0 / jnp.sqrt(in_channels))
    b6 = jax.random.normal(k6b, (representation_size,), dtype=jnp.float32) * 0.01
    w7 = jax.random.normal(k7w, (representation_size, representation_size),
                           dtype=jnp.float32) * (1.0 / jnp.sqrt(representation_size))
    b7 = jax.random.normal(k7b, (representation_size,), dtype=jnp.float32) * 0.01

    out = two_mlp_head(x, w6, b6, w7, b7)
    out = jax.block_until_ready(out)

    # Pure-JAX reference with matching bf16 MXU inputs / f32 accumulation.
    x2d = x.reshape(N, -1)
    xb = x2d.astype(jnp.bfloat16)
    w6b = w6.astype(jnp.bfloat16)
    w7b = w7.astype(jnp.bfloat16)
    h = jnp.maximum(jnp.dot(xb, w6b, preferred_element_type=jnp.float32) + b6, 0.0)
    ref = jnp.maximum(
        jnp.dot(h.astype(jnp.bfloat16), w7b, preferred_element_type=jnp.float32) + b7,
        0.0)

    assert out.shape == (N, representation_size)
    assert jnp.allclose(out, ref, atol=2e-2, rtol=2e-2)

    print("KERNEL_OK")
</pallas_src>

<mosaic_0001>
module attributes {stable_mosaic.version = 11 : i64} {
  func.func @two_mlp_head_kernel(%arg0: i32, %arg1: i32, %arg2: memref<128x256xbf16, #tpu.memory_space<vmem>>, %arg3: memref<256x128xbf16, #tpu.memory_space<vmem>>, %arg4: memref<1x128xf32, #tpu.memory_space<vmem>>, %arg5: memref<128x128xbf16, #tpu.memory_space<vmem>>, %arg6: memref<1x128xf32, #tpu.memory_space<vmem>>, %arg7: memref<128x128xf32, #tpu.memory_space<vmem>>, %arg8: memref<128x128xf32, #tpu.memory_space<vmem>>) attributes {dimension_semantics = [#tpu.dimension_semantics<parallel>, #tpu.dimension_semantics<arbitrary>], iteration_bounds = array<i64: 1, 1>, scalar_prefetch = 0 : i64, scratch_operands = 1 : i64, tpu.core_type = #tpu.core_type<tc>, window_params = [{transform_indices = @transform_0, window_bounds = array<i64: 128, 256>}, {transform_indices = @transform_1, window_bounds = array<i64: 256, 128>}, {pipeline_mode = #tpu.pipeline_mode<synchronous>, transform_indices = @transform_2, window_bounds = array<i64: 1, 128>}, {pipeline_mode = #tpu.pipeline_mode<synchronous>, transform_indices = @transform_3, window_bounds = array<i64: 128, 128>}, {pipeline_mode = #tpu.pipeline_mode<synchronous>, transform_indices = @transform_4, window_bounds = array<i64: 1, 128>}, {transform_indices = @transform_5, window_bounds = array<i64: 128, 128>}]} {
    %c0_i32 = arith.constant 0 : i32
    %0 = arith.cmpi eq, %arg1, %c0_i32 : i32
    %1 = arith.extui %0 : i1 to i32
    %c0_i32_0 = arith.constant 0 : i32
    %2 = arith.cmpi ne, %1, %c0_i32_0 : i32
    scf.if %2 {
      %cst_10 = arith.constant 0.000000e+00 : f32
      %12 = vector.broadcast %cst_10 : f32 to vector<128x128xf32>
      %c0_11 = arith.constant 0 : index
      %c0_12 = arith.constant 0 : index
      %13 = vector.load %arg8[%c0_11, %c0_12] : memref<128x128xf32, #tpu.memory_space<vmem>>, vector<128x128xf32>
      tpu.vector_store %arg8[%c0_11, %c0_12], %12 {strides = array<i32>} : memref<128x128xf32, #tpu.memory_space<vmem>>, vector<128x128xf32>,
    } else {
    }
    %c0 = arith.constant 0 : index
    %c0_1 = arith.constant 0 : index
    %3 = vector.load %arg8[%c0, %c0_1] : memref<128x128xf32, #tpu.memory_space<vmem>>, vector<128x128xf32>
    %c0_2 = arith.constant 0 : index
    %c0_3 = arith.constant 0 : index
    %4 = vector.load %arg2[%c0_2, %c0_3] : memref<128x256xbf16, #tpu.memory_space<vmem>>, vector<128x256xbf16>
    %c0_4 = arith.constant 0 : index
    %c0_5 = arith.constant 0 : index
    %5 = vector.load %arg3[%c0_4, %c0_5] : memref<256x128xbf16, #tpu.memory_space<vmem>>, vector<256x128xbf16>
    %cst = arith.constant dense<0.000000e+00> : vector<128x128xf32>
    %6 = tpu.matmul %4, %5, %cst {dimension_numbers = #tpu.dot_dimension_numbers<[1], [0], [0], [1], [0, 0, 1, 1], [], []>} : vector<128x256xbf16>, vector<256x128xbf16>, vector<128x128xf32> -> vector<128x128xf32>
    %7 = arith.addf %3, %6 : vector<128x128xf32>
    %c0_6 = arith.constant 0 : index
    %c0_7 = arith.constant 0 : index
    %8 = vector.load %arg8[%c0_6, %c0_7] : memref<128x128xf32, #tpu.memory_space<vmem>>, vector<128x128xf32>
    tpu.vector_store %arg8[%c0_6, %c0_7], %7 {strides = array<i32>} : memref<128x128xf32, #tpu.memory_space<vmem>>, vector<128x128xf32>,
    %c0_i32_8 = arith.constant 0 : i32
    %9 = arith.cmpi eq, %arg1, %c0_i32_8 : i32
    %10 = arith.extui %9 : i1 to i32
    %c0_i32_9 = arith.constant 0 : i32
    %11 = arith.cmpi ne, %10, %c0_i32_9 : i32
    scf.if %11 {
      %c0_10 = arith.constant 0 : index
      %c0_11 = arith.constant 0 : index
      %12 = vector.load %arg8[%c0_10, %c0_11] : memref<128x128xf32, #tpu.memory_space<vmem>>, vector<128x128xf32>
      %c0_12 = arith.constant 0 : index
      %c0_13 = arith.constant 0 : index
      %13 = vector.load %arg4[%c0_12, %c0_13] : memref<1x128xf32, #tpu.memory_space<vmem>>, vector<1x128xf32>
      %14 = vector.broadcast %13 : vector<1x128xf32> to vector<128x128xf32>
      %15 = arith.addf %12, %14 : vector<128x128xf32>
      %cst_14 = arith.constant 0.000000e+00 : f32
      %16 = vector.broadcast %cst_14 : f32 to vector<128x128xf32>
      %17 = arith.maximumf %15, %16 : vector<128x128xf32>
      %18 = arith.truncf %17 : vector<128x128xf32> to vector<128x128xbf16>
      %c0_15 = arith.constant 0 : index
      %c0_16 = arith.constant 0 : index
      %19 = vector.load %arg5[%c0_15, %c0_16] : memref<128x128xbf16, #tpu.memory_space<vmem>>, vector<128x128xbf16>
      %cst_17 = arith.constant dense<0.000000e+00> : vector<128x128xf32>
      %20 = tpu.matmul %18, %19, %cst_17 {dimension_numbers = #tpu.dot_dimension_numbers<[1], [0], [0], [1], [0, 0, 1, 1], [], []>} : vector<128x128xbf16>, vector<128x128xbf16>, vector<128x128xf32> -> vector<128x128xf32>
      %c0_18 = arith.constant 0 : index
      %c0_19 = arith.constant 0 : index
      %21 = vector.load %arg6[%c0_18, %c0_19] : memref<1x128xf32, #tpu.memory_space<vmem>>, vector<1x128xf32>
      %22 = vector.broadcast %21 : vector<1x128xf32> to vector<128x128xf32>
      %23 = arith.addf %20, %22 : vector<128x128xf32>
      %cst_20 = arith.constant 0.000000e+00 : f32
      %24 = vector.broadcast %cst_20 : f32 to vector<128x128xf32>
      %25 = arith.maximumf %23, %24 : vector<128x128xf32>
      %c0_21 = arith.constant 0 : index
      %c0_22 = arith.constant 0 : index
      %26 = vector.load %arg7[%c0_21, %c0_22] : memref<128x128xf32, #tpu.memory_space<vmem>>, vector<128x128xf32>
      tpu.vector_store %arg7[%c0_21, %c0_22], %25 {strides = array<i32>} : memref<128x128xf32, #tpu.memory_space<vmem>>, vector<128x128xf32>,
    } else {
    }
    return
  }
  func.func @transform_0(%arg0: i32, %arg1: i32) -> (i32, i32) {
    %c0_i32 = arith.constant 0 : i32
    return %arg0, %arg1 : i32, i32
  }
  func.func @transform_1(%arg0: i32, %arg1: i32) -> (i32, i32) {
    %c0_i32 = arith.constant 0 : i32
    %c0_i32_0 = arith.constant 0 : i32
    return %arg1, %c0_i32 : i32, i32
  }
  func.func @transform_2(%arg0: i32, %arg1: i32) -> (i32, i32) {
    %c0_i32 = arith.constant 0 : i32
    %c0_i32_0 = arith.constant 0 : i32
    %c0_i32_1 = arith.constant 0 : i32
    return %c0_i32, %c0_i32_0 : i32, i32
  }
  func.func @transform_3(%arg0: i32, %arg1: i32) -> (i32, i32) {
    %c0_i32 = arith.constant 0 : i32
    %c0_i32_0 = arith.constant 0 : i32
    %c0_i32_1 = arith.constant 0 : i32
    return %c0_i32, %c0_i32_0 : i32, i32
  }
  func.func @transform_4(%arg0: i32, %arg1: i32) -> (i32, i32) {
    %c0_i32 = arith.constant 0 : i32
    %c0_i32_0 = arith.constant 0 : i32
    %c0_i32_1 = arith.constant 0 : i32
    return %c0_i32, %c0_i32_0 : i32, i32
  }
  func.func @transform_5(%arg0: i32, %arg1: i32) -> (i32, i32) {
    %c0_i32 = arith.constant 0 : i32
    %c0_i32_0 = arith.constant 0 : i32
    return %arg0, %c0_i32 : i32, i32
  }
}

</mosaic_0001>

<bundles_post_ra>
// kernel: tpu_custom_call.1
= control target key start
LH: loop header
LB: loop body
LE: loop exit
PB: predicated region body
PF: predicated region fallthrough
CT: control target
= control target key end

     0   :  { %10 = vsyncpa [#allocation4], 0  ;;  %s1124_s0 = inlined_call_operand.hbm [shape: bf16[128,256], index: 0, kind: input, shape index: {}]   ;;  %s1125_s1 = inlined_call_operand.hbm [shape: bf16[256,128], index: 1, kind: input, shape index: {}]   ;;  %s1126_s2 = inlined_call_operand.vmem [shape: f32[1,128], index: 2, kind: input, shape index: {}]   ;;  %s1127_s3 = inlined_call_operand.hbm [shape: bf16[128,128], index: 3, kind: input, shape index: {}]   ;;  %s1128_s4 = inlined_call_operand.vmem [shape: f32[1,128], index: 4, kind: input, shape index: {}]   ;;  %s1129_s5 = inlined_call_operand.hbm [shape: f32[128,128], index: 5, kind: output, shape index: {}]  }
   0x1   :  { %11 = vsyncpa [#allocation7], 0  ;;  %s30_s20 = sshll.u32 %s1125_s1, 4  ;;  %s31_s20 = int_to_ptr.hbm [resolvable:$true] %s30_s20 }
   0x2   :  { %12 = vsyncpa [#allocation5], 0  ;;  %s1026_s21 = smov [#allocation6]   ;;  %s17_s25 = sshll.u32 %s1124_s0, 4  ;;  %s18_s25 = int_to_ptr.hbm [resolvable:$true] %s17_s25 }
   0x3   :  { %s32_s22 = sshll.u32 %s1026_s21, 4  ;;  %s1027_s26 = smov 64   ;;  %s33_s22 = int_to_ptr.vmem [resolvable:$true] %s32_s22 }
   0x4   :  { %s1028_s27 = smov 4   ;;  %s1029_s28 = smov [#allocation3]  }
   0x5   :  { %38 = dma.hbm_to_vmem [thread:$0]  %s31_s20, 2048, %s33_s22, [#allocation7], %s1027_s26, %s1027_s26, %s1028_s27  }
   0x6   :  { %s19_s29 = sshll.u32 %s1029_s28, 4  ;;  %s1030_s30 = smov 128   ;;  %s20_s29 = int_to_ptr.vmem [resolvable:$true] %s19_s29 }
   0x7   :  { %s1031_s6 = smov 8   ;;  %s45_s8 = sshll.u32 %s1127_s3, 4  ;;  %s46_s8 = int_to_ptr.hbm [resolvable:$true] %s45_s8 }
   0x8   :  { %25 = dma.hbm_to_vmem [thread:$0]  %s18_s25, 2048, %s20_s29, [#allocation4], %s1030_s30, %s1030_s30, %s1031_s6  }
   0x9   :  { %s1032_s9 = smov [#allocation8]  }
   0xa   :  { %s47_s0 = sshll.u32 %s1032_s9, 4  ;;  %s48_s0 = int_to_ptr.vmem [resolvable:$true] %s47_s0 }
   0xb   :  { %53 = dma.hbm_to_vmem [thread:$0]  %s46_s8, 1024, %s48_s0, [#allocation7], %s1027_s26, %s1027_s26, %s1028_s27  }
   0xc   :  { %1020 = dma.done.wait [#allocation4], 2048  }
   0xd   :  { %1021 = vsyncadd [#allocation4], 4294965248 }
   0xe   :  { %1022 = dma.done.wait [#allocation7], 3072  }
   0xf   :  { %1023 = vsyncadd [#allocation7], 4294964224  ;;  %v873_v0 = vld [vmem:[#allocation6 + $0x38] sm:$0xff]  ;;  %v872_v2 = vld [vmem:[#allocation6 + $0x30] sm:$0xff]  ;;  %s676_s15 = sshll.u32 %s1129_s5, 4  ;;  %s677_s15 = int_to_ptr.hbm [resolvable:$true] %s676_s15 }
  0x10   :  { %v881_v1 = vld [vmem:[#allocation6 + $0x78] sm:$0xff]  ;;  %328 = vmatpush.bf16.msra.mxu0 %v873_v0  ;;  %890 = vmatpush.bf16.msra.mxu3 %v873_v0  ;;  %v880_v3 = vld [vmem:[#allocation6 + $0x70] sm:$0xff]  ;;  %v871_v4 = vld [vmem:[#allocation6 + $0x28] sm:$0xff] }
  0x11   :  { %377 = vmatpush.bf16.msra.mxu1 %v881_v1  ;;  %v879_v5 = vld [vmem:[#allocation6 + $0x68] sm:$0xff]  ;;  %v870_v6 = vld [vmem:[#allocation6 + $0x20] sm:$0xff]  ;;  %v869_v8 = vld [vmem:[#allocation6 + $0x18] sm:$0xff] }
  0x12   :  { %v878_v7 = vld [vmem:[#allocation6 + $0x60] sm:$0xff]  ;;  %v877_v9 = vld [vmem:[#allocation6 + $0x58] sm:$0xff]  ;;  %v868_v10 = vld [vmem:[#allocation6 + $0x10] sm:$0xff] }
  0x13   :  { %v876_v11 = vld [vmem:[#allocation6 + $0x50] sm:$0xff]  ;;  %v867_v12 = vld [vmem:[#allocation6 + $0x8] sm:$0xff]  ;;  %v866_v14 = vld [vmem:[#allocation6] sm:$0xff] }
  0x14   :  { %329 = vmatpush.bf16.msra.mxu0 %v872_v2  ;;  %891 = vmatpush.bf16.msra.mxu3 %v872_v2  ;;  %v875_v13 = vld [vmem:[#allocation6 + $0x48] sm:$0xff]  ;;  %v692_v15 = vld [vmem:[#allocation3] sm:$0xf]  ;;  %v850_v20 = vld [vmem:[#allocation3 + $0x4] sm:$0xf] }
  0x15   :  { %378 = vmatpush.bf16.msra.mxu1 %v880_v3  ;;  %v851_v16 = vld [vmem:[#allocation3 + $0x4] sm:$0xf0]  ;;  %v740_v17 = vld [vmem:[#allocation3 + $0x60] sm:$0xf]  ;;  %v694_v21 = vld [vmem:[#allocation3 + $0x8] sm:$0xf0] }
  0x16   :  { %v863_v18 = vld [vmem:[#allocation3 + $0x64] sm:$0xf0]  ;;  %v874_v19 = vld [vmem:[#allocation6 + $0x40] sm:$0xff]  ;;  %v693_v22 = vor.u32 %v851_v16, %v692_v15  ;;  %v697_v24 = vor.u32 %v850_v20, %v694_v21  ;;  %v700_v25 = vld [vmem:[#allocation3 + $0x10] sm:$0xf] }
  0x17   :  { %v741_v23 = vor.u32 %v863_v18, %v740_v17  ;;  %v853_v26 = vld [vmem:[#allocation3 + $0x14] sm:$0xf0]  ;;  %v748_v27 = vld [vmem:[#allocation3 + $0x70] sm:$0xf]  ;;  %v852_v29 = vld [vmem:[#allocation3 + $0x14] sm:$0xf] }
  0x18   :  { %330 = vmatpush.bf16.msra.mxu0 %v871_v4  ;;  %892 = vmatpush.bf16.msra.mxu3 %v871_v4  ;;  %v865_v28 = vld [vmem:[#allocation3 + $0x74] sm:$0xf0]  ;;  %v702_v30 = vld [vmem:[#allocation3 + $0x18] sm:$0xf0]  ;;  %v701_v31 = vor.u32 %v853_v26, %v700_v25  ;;  %v708_v34 = vld [vmem:[#allocation3 + $0x20] sm:$0xf] }
  0x19   :  { %379 = vmatpush.bf16.msra.mxu1 %v879_v5  ;;  %v749_v32 = vor.u32 %v865_v28, %v748_v27  ;;  %v705_v33 = vor.u32 %v852_v29, %v702_v30  ;;  %v855_v35 = vld [vmem:[#allocation3 + $0x24] sm:$0xf0]  ;;  %v862_v36 = vld [vmem:[#allocation3 + $0x64] sm:$0xf]  ;;  %v742_v37 = vld [vmem:[#allocation3 + $0x68] sm:$0xf0] }
  0x1a   :  { %v854_v38 = vld [vmem:[#allocation3 + $0x24] sm:$0xf]  ;;  %v710_v39 = vld [vmem:[#allocation3 + $0x28] sm:$0xf0]  ;;  %v709_v40 = vor.u32 %v855_v35, %v708_v34  ;;  %v745_v41 = vor.u32 %v862_v36, %v742_v37  ;;  %v716_v43 = vld [vmem:[#allocation3 + $0x30] sm:$0xf] }
  0x1b   :  { %v713_v42 = vor.u32 %v854_v38, %v710_v39  ;;  %v857_v44 = vld [vmem:[#allocation3 + $0x34] sm:$0xf0]  ;;  %v864_v45 = vld [vmem:[#allocation3 + $0x74] sm:$0xf]  ;;  %v750_v46 = vld [vmem:[#allocation3 + $0x78] sm:$0xf0] }
  0x1c   :  { %331 = vmatpush.bf16.msra.mxu0 %v870_v6  ;;  %893 = vmatpush.bf16.msra.mxu3 %v870_v6  ;;  %v856_v47 = vld [vmem:[#allocation3 + $0x34] sm:$0xf]  ;;  %v718_v48 = vld [vmem:[#allocation3 + $0x38] sm:$0xf0]  ;;  %v717_v49 = vor.u32 %v857_v44, %v716_v43  ;;  %v753_v50 = vor.u32 %v864_v45, %v750_v46  ;;  %v887_v54 = vld [vmem:[#allocation8 + $0x28] sm:$0xff] }
  0x1d   :  { %380 = vmatpush.bf16.msra.mxu1 %v878_v7  ;;  %v721_v51 = vor.u32 %v856_v47, %v718_v48  ;;  %v889_v52 = vld [vmem:[#allocation8 + $0x38] sm:$0xff]  ;;  %v888_v53 = vld [vmem:[#allocation8 + $0x30] sm:$0xff]  ;;  %v724_v55 = vld [vmem:[#allocation3 + $0x40] sm:$0xf] }
  0x1e   :  { %589 = vmatpush.bf16.msra.mxu2 %v889_v52  ;;  %v859_v56 = vld [vmem:[#allocation3 + $0x44] sm:$0xf0]  ;;  %v858_v57 = vld [vmem:[#allocation3 + $0x44] sm:$0xf]  ;;  %v726_v58 = vld [vmem:[#allocation3 + $0x48] sm:$0xf0] }
  0x1f   :  { %v886_v59 = vld [vmem:[#allocation8 + $0x20] sm:$0xff]  ;;  %v725_v60 = vor.u32 %v859_v56, %v724_v55  ;;  %v729_v61 = vor.u32 %v858_v57, %v726_v58  ;;  %v732_v62 = vld [vmem:[#allocation3 + $0x50] sm:$0xf]  ;;  %v861_v63 = vld [vmem:[#allocation3 + $0x54] sm:$0xf0] }
  0x20   :  { %332 = vmatpush.bf16.msra.mxu0 %v869_v8  ;;  %894 = vmatpush.bf16.msra.mxu3 %v869_v8  ;;  %v860_v0 = vld [vmem:[#allocation3 + $0x54] sm:$0xf]  ;;  %v733_v2 = vor.u32 %v861_v63, %v732_v62  ;;  %v885_v4 = vld [vmem:[#allocation8 + $0x18] sm:$0xff]  ;;  %v883_v6 = vld [vmem:[#allocation8 + $0x8] sm:$0xff] }
  0x21   :  { %381 = vmatpush.bf16.msra.mxu1 %v877_v9 }
  0x22   :  { %590 = vmatpush.bf16.msra.mxu2 %v888_v53 }
  0x24   :  { %333 = vmatpush.bf16.msra.mxu0 %v868_v10  ;;  %895 = vmatpush.bf16.msra.mxu3 %v868_v10 }
  0x25   :  { %382 = vmatpush.bf16.msra.mxu1 %v876_v11 }
  0x26   :  { %591 = vmatpush.bf16.msra.mxu2 %v887_v54 }
  0x28   :  { %334 = vmatpush.bf16.msra.mxu0 %v867_v12  ;;  %896 = vmatpush.bf16.msra.mxu3 %v867_v12 }
  0x29   :  { %383 = vmatpush.bf16.msra.mxu1 %v875_v13 }
  0x2a   :  { %592 = vmatpush.bf16.msra.mxu2 %v886_v59 }
  0x2c   :  { %335 = vmatpush.bf16.msra.mxu0 %v866_v14  ;;  %897 = vmatpush.bf16.msra.mxu3 %v866_v14 }
  0x2d   :  { %384 = vmatpush.bf16.msra.mxu1 %v874_v19 }
  0x2e   :  { %593 = vmatpush.bf16.msra.mxu2 %v885_v4 }
  0x2f   :  { %336 = vmatmul.bf16.vlgmr.msra.gmra.mxu0 %v693_v22  ;;  %366 = vmatmul.bf16.vlgmr.msra.gmra.mxu3 %v741_v23 }
  0x30   :  { %898 = vmatpush.bf16.msrb.mxu3 %v881_v1  ;;  %385 = vmatmul.bf16.vlgmr.msra.gmra.mxu1 %v697_v24  ;;  %v734_v1 = vld [vmem:[#allocation3 + $0x58] sm:$0xf0] }
  0x34   :  { %899 = vmatpush.bf16.msrb.mxu3 %v880_v3  ;;  %v737_v3 = vor.u32 %v860_v0, %v734_v1 }
  0x38   :  { %900 = vmatpush.bf16.msrb.mxu3 %v879_v5  ;;  %v884_v5 = vld [vmem:[#allocation8 + $0x10] sm:$0xff] }
  0x39   :  { %594 = vmatpush.bf16.msra.mxu2 %v884_v5 }
  0x3c   :  { %901 = vmatpush.bf16.msrb.mxu3 %v878_v7  ;;  %v882_v7 = vld [vmem:[#allocation8] sm:$0xff] }
  0x3d   :  { %595 = vmatpush.bf16.msra.mxu2 %v883_v6 }
  0x3f   :  { %341 = vmatmul.bf16.gmra.mxu0 %v701_v31  ;;  %371 = vmatmul.bf16.gmra.mxu3 %v749_v32 }
  0x40   :  { %902 = vmatpush.bf16.msrb.mxu3 %v877_v9  ;;  %390 = vmatmul.bf16.gmra.mxu1 %v705_v33 }
  0x41   :  { %596 = vmatpush.bf16.msra.mxu2 %v882_v7 }
  0x44   :  { %903 = vmatpush.bf16.msrb.mxu3 %v876_v11  ;;  %v1079_v11 = vld [vmem:[%s1126_s2] ss:$0 sm:$0xff] }
  0x48   :  { %904 = vmatpush.bf16.msrb.mxu3 %v875_v13 }
  0x4c   :  { %905 = vmatpush.bf16.msrb.mxu3 %v874_v19 }
  0x4f   :  { %346 = vmatmul.bf16.gmra.mxu0 %v709_v40  ;;  %415 = vmatmul.bf16.vlgmr.msrb.gmra.mxu3 %v745_v41 }
  0x50   :  { %395 = vmatmul.bf16.gmra.mxu1 %v713_v42  ;;  %906 = vmatpush.bf16.msra.mxu3 %v889_v52 }
  0x54   :  { %907 = vmatpush.bf16.msra.mxu3 %v888_v53 }
  0x58   :  { %908 = vmatpush.bf16.msra.mxu3 %v887_v54 }
  0x5c   :  { %909 = vmatpush.bf16.msra.mxu3 %v886_v59 }
  0x5f   :  { %351 = vmatmul.bf16.gmra.mxu0 %v717_v49  ;;  %420 = vmatmul.bf16.gmra.mxu3 %v753_v50 }
  0x60   :  { %400 = vmatmul.bf16.gmra.mxu1 %v721_v51  ;;  %910 = vmatpush.bf16.msra.mxu3 %v885_v4 }
  0x64   :  { %911 = vmatpush.bf16.msra.mxu3 %v884_v5 }
  0x68   :  { %912 = vmatpush.bf16.msra.mxu3 %v883_v6 }
  0x6c   :  { %913 = vmatpush.bf16.msra.mxu3 %v882_v7 }
  0x6f   :  { %356 = vmatmul.bf16.gmra.mxu0 %v725_v60 }
  0x70   :  { %405 = vmatmul.bf16.gmra.mxu1 %v729_v61 }
  0x7f   :  { %361 = vmatmul.bf16.gmra.mxu0 %v733_v2 }
  0x80   :  { %410 = vmatmul.bf16.gmra.mxu1 %v737_v3 }
  0xac   :  { %v337_v8 = vpop.f32.mrf.mxu0 }
  0xad   :  { %v386_v9 = vpop.f32.mrf.mxu1 }
  0xae   :  { %v387_v10 = vadd.f32 %v386_v9, %v337_v8 }
  0xb0   :  { %v481_v15 = vadd.f32 %v1079_v11, %v387_v10 }
  0xb2   :  { %v367_v12 = vpop.f32.mrf.mxu3  ;;  %v497_v18 = vmax.f32 %v481_v15, 0.0 }
  0xb4   :  { %v339_v13 = vpop.f32.mrf.mxu0 }
  0xb5   :  { %v388_v14 = vpop.f32.mrf.mxu1 }
  0xb6   :  { %v389_v16 = vadd.f32 %v388_v14, %v339_v13 }
  0xb8   :  { %v482_v17 = vadd.f32 %v1079_v11, %v389_v16 }
  0xba   :  { %v498_v19 = vmax.f32 %v482_v17, 0.0  ;;  %v369_v20 = vpop.f32.mrf.mxu3 }
  0xbc   :  { %v342_v21 = vpop.f32.mrf.mxu0  ;;  %v513_v22 = vpack.c.bf16 %v498_v19, %v497_v18 }
  0xbd   :  { %v391_v23 = vpop.f32.mrf.mxu1 }
  0xbe   :  { %597 = vmatmul.bf16.vlgmr.msra.gmra.mxu2 %v513_v22  ;;  %v392_v24 = vadd.f32 %v391_v23, %v342_v21 }
  0xc0   :  { %v483_v28 = vadd.f32 %v1079_v11, %v392_v24 }
  0xc2   :  { %v372_v25 = vpop.f32.mrf.mxu3  ;;  %v499_v31 = vmax.f32 %v483_v28, 0.0 }
  0xc4   :  { %v344_v26 = vpop.f32.mrf.mxu0 }
  0xc5   :  { %v393_v27 = vpop.f32.mrf.mxu1 }
  0xc6   :  { %v394_v29 = vadd.f32 %v393_v27, %v344_v26 }
  0xc8   :  { %v484_v30 = vadd.f32 %v1079_v11, %v394_v29 }
  0xca   :  { %v500_v32 = vmax.f32 %v484_v30, 0.0  ;;  %v374_v33 = vpop.f32.mrf.mxu3 }
  0xcc   :  { %v347_v34 = vpop.f32.mrf.mxu0  ;;  %v514_v35 = vpack.c.bf16 %v500_v32, %v499_v31 }
  0xcd   :  { %v396_v36 = vpop.f32.mrf.mxu1 }
  0xce   :  { %602 = vmatmul.bf16.gmra.mxu2 %v514_v35  ;;  %v397_v37 = vadd.f32 %v396_v36, %v347_v34  ;;  %v1100_v34 = vld [vmem:[%s1128_s4] ss:$0 sm:$0xff]  ;;  %s1033_s4 = smov [#allocation9]  }
  0xcf   :  { %s674_s12 = sshll.u32 %s1033_s4, 4  ;;  %s675_s12 = int_to_ptr.vmem [resolvable:$true] %s674_s12 }
  0xd0   :  { %v485_v41 = vadd.f32 %v1079_v11, %v397_v37 }
  0xd2   :  { %v416_v38 = vpop.f32.mrf.mxu3  ;;  %v501_v45 = vmax.f32 %v485_v41, 0.0 }
  0xd3   :  { %v417_v43 = vadd.f32 %v416_v38, %v367_v12 }
  0xd4   :  { %v349_v39 = vpop.f32.mrf.mxu0 }
  0xd5   :  { %v398_v40 = vpop.f32.mrf.mxu1  ;;  %v493_v48 = vadd.f32 %v1079_v11, %v417_v43 }
  0xd6   :  { %v399_v42 = vadd.f32 %v398_v40, %v349_v39 }
  0xd7   :  { %v509_v54 = vmax.f32 %v493_v48, 0.0 }
  0xd8   :  { %v486_v44 = vadd.f32 %v1079_v11, %v399_v42 }
  0xda   :  { %v502_v46 = vmax.f32 %v486_v44, 0.0  ;;  %v418_v47 = vpop.f32.mrf.mxu3 }
  0xdb   :  { %v419_v49 = vadd.f32 %v418_v47, %v369_v20 }
  0xdc   :  { %v352_v50 = vpop.f32.mrf.mxu0  ;;  %v515_v51 = vpack.c.bf16 %v502_v46, %v501_v45 }
  0xdd   :  { %v494_v52 = vadd.f32 %v1079_v11, %v419_v49  ;;  %v401_v53 = vpop.f32.mrf.mxu1 }
  0xde   :  { %607 = vmatmul.bf16.gmra.mxu2 %v515_v51  ;;  %v402_v57 = vadd.f32 %v401_v53, %v352_v50 }
  0xdf   :  { %v510_v55 = vmax.f32 %v494_v52, 0.0 }
  0xe0   :  { %v487_v61 = vadd.f32 %v1079_v11, %v402_v57 }
  0xe1   :  { %v519_v56 = vpack.c.bf16 %v510_v55, %v509_v54 }
  0xe2   :  { %v421_v58 = vpop.f32.mrf.mxu3  ;;  %v503_v1 = vmax.f32 %v487_v61, 0.0 }
  0xe3   :  { %627 = vmatmul.bf16.vlgmr.msra.gmra.mxu3 %v519_v56  ;;  %v422_v63 = vadd.f32 %v421_v58, %v372_v25 }
  0xe4   :  { %v354_v59 = vpop.f32.mrf.mxu0 }
  0xe5   :  { %v403_v60 = vpop.f32.mrf.mxu1  ;;  %v495_v4 = vadd.f32 %v1079_v11, %v422_v63 }
  0xe6   :  { %v404_v62 = vadd.f32 %v403_v60, %v354_v59 }
  0xe7   :  { %v511_v10 = vmax.f32 %v495_v4, 0.0 }
  0xe8   :  { %v488_v0 = vadd.f32 %v1079_v11, %v404_v62 }
  0xea   :  { %v504_v2 = vmax.f32 %v488_v0, 0.0  ;;  %v423_v3 = vpop.f32.mrf.mxu3 }
  0xeb   :  { %v424_v5 = vadd.f32 %v423_v3, %v374_v33 }
  0xec   :  { %v357_v6 = vpop.f32.mrf.mxu0  ;;  %v516_v7 = vpack.c.bf16 %v504_v2, %v503_v1 }
  0xed   :  { %v496_v8 = vadd.f32 %v1079_v11, %v424_v5  ;;  %v406_v9 = vpop.f32.mrf.mxu1 }
  0xee   :  { %612 = vmatmul.bf16.gmra.mxu2 %v516_v7  ;;  %v407_v14 = vadd.f32 %v406_v9, %v357_v6 }
  0xef   :  { %v512_v12 = vmax.f32 %v496_v8, 0.0 }
  0xf0   :  { %v489_v17 = vadd.f32 %v1079_v11, %v407_v14 }
  0xf1   :  { %v520_v13 = vpack.c.bf16 %v512_v12, %v511_v10 }
  0xf2   :  { %v505_v20 = vmax.f32 %v489_v17, 0.0 }
  0xf3   :  { %632 = vmatmul.bf16.gmra.mxu3 %v520_v13 }
  0xf4   :  { %v359_v15 = vpop.f32.mrf.mxu0 }
  0xf5   :  { %v408_v16 = vpop.f32.mrf.mxu1 }
  0xf6   :  { %v409_v18 = vadd.f32 %v408_v16, %v359_v15 }
  0xf8   :  { %v490_v19 = vadd.f32 %v1079_v11, %v409_v18 }
  0xfa   :  { %v506_v21 = vmax.f32 %v490_v19, 0.0 }
  0xfc   :  { %v362_v22 = vpop.f32.mrf.mxu0  ;;  %v517_v23 = vpack.c.bf16 %v506_v21, %v505_v20 }
  0xfd   :  { %v411_v24 = vpop.f32.mrf.mxu1 }
  0xfe   :  { %617 = vmatmul.bf16.gmra.mxu2 %v517_v23  ;;  %v412_v25 = vadd.f32 %v411_v24, %v362_v22 }
 0x100   :  { %v491_v28 = vadd.f32 %v1079_v11, %v412_v25 }
 0x102   :  { %v507_v31 = vmax.f32 %v491_v28, 0.0 }
 0x104   :  { %v364_v26 = vpop.f32.mrf.mxu0 }
 0x105   :  { %v413_v27 = vpop.f32.mrf.mxu1 }
 0x106   :  { %v414_v29 = vadd.f32 %v413_v27, %v364_v26 }
 0x108   :  { %v492_v30 = vadd.f32 %v1079_v11, %v414_v29 }
 0x10a   :  { %v508_v32 = vmax.f32 %v492_v30, 0.0 }
 0x10c   :  { %v518_v33 = vpack.c.bf16 %v508_v32, %v507_v31 }
 0x10e   :  { %622 = vmatmul.bf16.gmra.mxu2 %v518_v33 }
 0x141   :  { %v598_v35 = vpop.f32.mrf.mxu2 }
 0x142   :  { %v599_v36 = vadd.f32 %v1100_v34, %v598_v35 }
 0x144   :  { %v638_v37 = vmax.f32 %v599_v36, 0.0 }
 0x146   :  { %654 = vst [vmem:[#allocation9] sm:$0xff] %v638_v37 }
 0x149   :  { %v600_v38 = vpop.f32.mrf.mxu2 }
 0x14a   :  { %v601_v39 = vadd.f32 %v1100_v34, %v600_v38 }
 0x14c   :  { %v639_v40 = vmax.f32 %v601_v39, 0.0 }
 0x14e   :  { %655 = vst [vmem:[#allocation9 + $0x8] sm:$0xff] %v639_v40 }
 0x151   :  { %v603_v11 = vpop.f32.mrf.mxu2 }
 0x152   :  { %v604_v41 = vadd.f32 %v1100_v34, %v603_v11 }
 0x154   :  { %v640_v42 = vmax.f32 %v604_v41, 0.0 }
 0x156   :  { %656 = vst [vmem:[#allocation9 + $0x10] sm:$0xff] %v640_v42 }
 0x159   :  { %v605_v43 = vpop.f32.mrf.mxu2 }
 0x15a   :  { %v606_v44 = vadd.f32 %v1100_v34, %v605_v43 }
 0x15c   :  { %v641_v45 = vmax.f32 %v606_v44, 0.0 }
 0x15e   :  { %657 = vst [vmem:[#allocation9 + $0x18] sm:$0xff] %v641_v45 }
 0x161   :  { %v608_v46 = vpop.f32.mrf.mxu2 }
 0x162   :  { %v609_v47 = vadd.f32 %v1100_v34, %v608_v46 }
 0x164   :  { %v642_v48 = vmax.f32 %v609_v47, 0.0 }
 0x166   :  { %658 = vst [vmem:[#allocation9 + $0x20] sm:$0xff] %v642_v48  ;;  %v628_v49 = vpop.f32.mrf.mxu3 }
 0x167   :  { %v629_v50 = vadd.f32 %v1100_v34, %v628_v49 }
 0x169   :  { %v650_v51 = vmax.f32 %v629_v50, 0.0  ;;  %v610_v52 = vpop.f32.mrf.mxu2 }
 0x16a   :  { %v611_v53 = vadd.f32 %v1100_v34, %v610_v52 }
 0x16b   :  { %666 = vst [vmem:[#allocation9 + $0x60] sm:$0xff] %v650_v51 }
 0x16c   :  { %v643_v54 = vmax.f32 %v611_v53, 0.0 }
 0x16e   :  { %659 = vst [vmem:[#allocation9 + $0x28] sm:$0xff] %v643_v54  ;;  %v630_v55 = vpop.f32.mrf.mxu3 }
 0x16f   :  { %v631_v56 = vadd.f32 %v1100_v34, %v630_v55 }
 0x171   :  { %v651_v57 = vmax.f32 %v631_v56, 0.0  ;;  %v613_v58 = vpop.f32.mrf.mxu2 }
 0x172   :  { %v614_v59 = vadd.f32 %v1100_v34, %v613_v58 }
 0x173   :  { %667 = vst [vmem:[#allocation9 + $0x68] sm:$0xff] %v651_v57 }
 0x174   :  { %v644_v60 = vmax.f32 %v614_v59, 0.0 }
 0x176   :  { %660 = vst [vmem:[#allocation9 + $0x30] sm:$0xff] %v644_v60  ;;  %v633_v61 = vpop.f32.mrf.mxu3 }
 0x177   :  { %v634_v62 = vadd.f32 %v1100_v34, %v633_v61 }
 0x179   :  { %v652_v63 = vmax.f32 %v634_v62, 0.0  ;;  %v615_v0 = vpop.f32.mrf.mxu2 }
 0x17a   :  { %v616_v1 = vadd.f32 %v1100_v34, %v615_v0 }
 0x17b   :  { %668 = vst [vmem:[#allocation9 + $0x70] sm:$0xff] %v652_v63 }
 0x17c   :  { %v645_v2 = vmax.f32 %v616_v1, 0.0 }
 0x17e   :  { %661 = vst [vmem:[#allocation9 + $0x38] sm:$0xff] %v645_v2  ;;  %v635_v3 = vpop.f32.mrf.mxu3 }
 0x17f   :  { %v636_v4 = vadd.f32 %v1100_v34, %v635_v3 }
 0x181   :  { %v653_v5 = vmax.f32 %v636_v4, 0.0  ;;  %v618_v6 = vpop.f32.mrf.mxu2 }
 0x182   :  { %v619_v7 = vadd.f32 %v1100_v34, %v618_v6 }
 0x183   :  { %669 = vst [vmem:[#allocation9 + $0x78] sm:$0xff] %v653_v5 }
 0x184   :  { %v646_v8 = vmax.f32 %v619_v7, 0.0 }
 0x186   :  { %662 = vst [vmem:[#allocation9 + $0x40] sm:$0xff] %v646_v8 }
 0x189   :  { %v620_v9 = vpop.f32.mrf.mxu2 }
 0x18a   :  { %v621_v10 = vadd.f32 %v1100_v34, %v620_v9 }
 0x18c   :  { %v647_v12 = vmax.f32 %v621_v10, 0.0 }
 0x18e   :  { %663 = vst [vmem:[#allocation9 + $0x48] sm:$0xff] %v647_v12 }
 0x191   :  { %v623_v13 = vpop.f32.mrf.mxu2 }
 0x192   :  { %v624_v14 = vadd.f32 %v1100_v34, %v623_v13 }
 0x194   :  { %v648_v15 = vmax.f32 %v624_v14, 0.0 }
 0x196   :  { %664 = vst [vmem:[#allocation9 + $0x50] sm:$0xff] %v648_v15 }
 0x199   :  { %v625_v16 = vpop.f32.mrf.mxu2 }
 0x19a   :  { %v626_v17 = vadd.f32 %v1100_v34, %v625_v16 }
 0x19c   :  { %v649_v18 = vmax.f32 %v626_v17, 0.0 }
 0x19e   :  { %665 = vst [vmem:[#allocation9 + $0x58] sm:$0xff] %v649_v18 }
 0x19f   :  { %682 = dma.vmem_to_hbm [thread:$0]  %s675_s12, 2048, %s677_s15, [#allocation5], %s1030_s30, %s1030_s30, %s1031_s6  }
 0x1a0   :  { %1024 = dma.done.wait [#allocation5], 2048  }
 0x1a1   :  { %1025 = vsyncadd [#allocation5], 4294965248 }
 0x1a2   :  { %687 = vsyncpa [#allocation4], 1 }
 0x1a3   :  { %688 = vsyncpa [#allocation7], 1 }
 0x1a4   :  { %689 = vsyncpa [#allocation5], 1 }

</bundles_post_ra>
